<compile_context>
chip_gen: v5e
topology: v5e:2x2
jax: 0.10.0
libtpu: 0.0.40
codegen_flags: <defaults>
</compile_context>

<pallas_src>
import jax
import jax.numpy as jnp
import numpy as np
from jax.experimental import pallas as pl
from jax.experimental.pallas import tpu as pltpu

NEG_SLOPE = 0.01  # torch.nn.LeakyReLU() default negative_slope


# ------------------------------ Pallas kernel -------------------------------


def _cbgnn_fused_kernel(xt_ref,    # VMEM [F_in, NN]  packed node features^T (bf16)
                        a_ref,     # VMEM [NN, NN]    block-diag symmetric A_hat (bf16)
                        wt_ref,    # VMEM [F_out, F_in] shared GNN weight^T (bf16)
                        ssrc_ref,  # VMEM [NN, EE]    block-diag one-hot src selector (bf16)
                        sdst_ref,  # VMEM [NN, EE]    block-diag one-hot dst selector (bf16)
                        winc_ref,  # VMEM [EE, CP]    block-diag (ce * incidence)^T, lane-padded (bf16)
                        out_ref):  # VMEM [1, CP]     per-model packed cycle scores (f32)
    f32 = jnp.float32
    bf16 = jnp.bfloat16

    # encode: z^T = LeakyReLU(W^T @ (X^T @ A_hat)).  A_hat is (block-diag)
    # symmetric, so this equals ((A_hat @ X) @ W)^T.  bf16 MXU, f32 accumulate.
    ht = jnp.dot(xt_ref[...], a_ref[...], preferred_element_type=f32)        # [F_in, NN]
    zt = jnp.dot(wt_ref[...], ht.astype(bf16), preferred_element_type=f32)   # [F_out, NN]
    zt = jnp.where(zt > 0, zt, NEG_SLOPE * zt).astype(bf16)                  # LeakyReLU

    # edge-endpoint gather on the MXU (one-hot selectors; exact in bf16).
    # TODO(synk): replace with scalar-prefetched index gather at scale.
    zsrc = jnp.dot(zt, ssrc_ref[...], preferred_element_type=f32)            # [F_out, EE]
    zdst = jnp.dot(zt, sdst_ref[...], preferred_element_type=f32)            # [F_out, EE]

    # decode: per-(feature, edge) products aggregated straight into cycles
    # using F_out MXU rows, then a single cross-sublane reduce.
    pe = (zsrc * zdst).astype(bf16)                                          # [F_out, EE]
    p = jnp.dot(pe, winc_ref[...], preferred_element_type=f32)               # [F_out, CP]
    out_ref[...] = jnp.sum(p, axis=0, keepdims=True)                         # [1, CP]


def cbgnn_fused(xt, a, wt, ssrc, sdst, winc, cp):
    vmem = pl.BlockSpec(memory_space=pltpu.MemorySpace.VMEM)
    return pl.pallas_call(
        _cbgnn_fused_kernel,
        out_shape=jax.ShapeDtypeStruct((1, cp), jnp.float32),
        in_specs=[vmem] * 6,
        out_specs=pl.BlockSpec(memory_space=pltpu.MemorySpace.VMEM),
        compiler_params=pltpu.CompilerParams(
            vmem_limit_bytes=32 * 1024 * 1024),   # explicit budget (v7x: 64 MiB phys)
    )(xt, a, wt, ssrc, sdst, winc)


# ------------------------------- glue (host) --------------------------------


def to_undirected(edge_index):
    # concatenate reversed edges (torch_geometric.utils.to_undirected); the
    # example graphs contain no duplicates by construction.
    rev = edge_index[::-1, :]
    return np.concatenate([edge_index, rev], axis=1)


def gcn_normalized_adjacency(edge_index, num_nodes):
    a = np.zeros((num_nodes, num_nodes), np.float32)
    a[edge_index[0], edge_index[1]] = 1.0
    a = a + np.eye(num_nodes, dtype=np.float32)          # self loops
    deg = a.sum(axis=1)
    d_inv_sqrt = 1.0 / np.sqrt(np.maximum(deg, 1e-12))
    # symmetric normalization of an undirected graph -> A_hat is symmetric,
    # which the transposed in-kernel encode relies on.
    return (d_inv_sqrt[:, None] * a) * d_inv_sqrt[None, :]


def _build_packed_inputs(features_list, edge_index_list, edge2cycle_list):
    """Pack all models along the lane axis (block-diagonal structure)."""
    model_num = len(features_list)
    xs, ahs, srcs, dsts, incs, ces = [], [], [], [], [], []
    for m in range(model_num):
        x = np.asarray(features_list[m], np.float32)                 # [N, F_in]
        n = x.shape[0]
        ei = to_undirected(np.asarray(edge_index_list[m]))           # [2, E]
        e = ei.shape[1]
        a_hat = gcn_normalized_adjacency(ei, n)                      # [N, N]
        e2c = np.asarray(edge2cycle_list[m])                         # [C, k]
        inc = (np.arange(e)[None, None, :] == e2c[:, :, None]).any(axis=1)
        inc = inc.astype(np.float32)                                 # [C, E]
        ce = np.ones((e,), np.float32)                               # permuteCE init
        xs.append(x); ahs.append(a_hat)
        srcs.append(ei[0]); dsts.append(ei[1])
        incs.append(inc); ces.append(ce)

    f_in = xs[0].shape[1]
    ns = [x.shape[0] for x in xs]
    es = [len(s) for s in srcs]
    cs = [inc.shape[0] for inc in incs]
    nn, ee, cc = sum(ns), sum(es), sum(cs)
    cp = max(128, int(np.ceil(cc / 128)) * 128)      # lane-dense padded output width

    xt_pack = np.zeros((f_in, nn), np.float32)
    a_pack = np.zeros((nn, nn), np.float32)
    ssrc_pack = np.zeros((nn, ee), np.float32)
    sdst_pack = np.zeros((nn, ee), np.float32)
    winc_pack = np.zeros((ee, cp), np.float32)

    n_off = e_off = c_off = 0
    for m in range(model_num):
        n, e, c = ns[m], es[m], cs[m]
        xt_pack[:, n_off:n_off + n] = xs[m].T
        a_pack[n_off:n_off + n, n_off:n_off + n] = ahs[m]
        ssrc_pack[n_off + srcs[m], e_off + np.arange(e)] = 1.0
        sdst_pack[n_off + dsts[m], e_off + np.arange(e)] = 1.0
        # permuteCE (all-ones at init) folded into the incidence rows.
        winc_pack[e_off:e_off + e, c_off:c_off + c] = ces[m][:, None] * incs[m].T
        n_off, e_off, c_off = n_off + n, e_off + e, c_off + c

    return xt_pack, a_pack, ssrc_pack, sdst_pack, winc_pack, cs, cp


def cbgnn_forward(features_list, edge_index_list, edge2cycle_list,
                  gnn_weight, cpmlp, temperature=1.0):
    """Mirrors CBGNN.forward with learn_feature=False, learn_combine=True."""
    xt, a, ssrc, sdst, winc, cs, cp = _build_packed_inputs(
        features_list, edge_index_list, edge2cycle_list)
    assert len(set(cs)) == 1, "torch cat semantics require equal #cycles per model"
    c, m = cs[0], len(cs)

    bf16 = jnp.bfloat16
    wt = jnp.asarray(gnn_weight, jnp.float32).T.astype(bf16)          # [F_out, F_in]

    out_row = cbgnn_fused(jnp.asarray(xt, bf16), jnp.asarray(a, bf16), wt,
                          jnp.asarray(ssrc, bf16), jnp.asarray(sdst, bf16),
                          jnp.asarray(winc, bf16), cp)                # [1, CP]

    # learn_combine=True head: Scores.mm(softmax(CPMLP / temperature)) on the
    # per-model [C, M] score matrix (tiny -> plain JAX, per review).
    scores = out_row[0, :m * c].reshape(m, c).T                       # [C, M]
    w = jax.nn.softmax(
        jnp.asarray(cpmlp, jnp.float32).reshape(-1) / jnp.float32(temperature))
    return scores @ w


# ------------------------------ references ----------------------------------


def _reference_forward_f32(features_list, edge_index_list, edge2cycle_list,
                           gnn_weight, cpmlp, temperature=1.0):
    """Pure-JAX f32 reference of the torch forward semantics."""
    cols = []
    for mc in range(len(features_list)):
        x = jnp.asarray(features_list[mc], jnp.float32)
        n = x.shape[0]
        ei = to_undirected(np.asarray(edge_index_list[mc]))
        e = ei.shape[1]
        a_hat = jnp.asarray(gcn_normalized_adjacency(ei, n))
        z = (a_hat @ x) @ jnp.asarray(gnn_weight, jnp.float32)
        z = jnp.where(z > 0, z, NEG_SLOPE * z)
        edge = jnp.sum(z[jnp.asarray(ei[0])] * z[jnp.asarray(ei[1])], axis=-1)
        edge = edge * jnp.ones((e,), jnp.float32)                     # permuteCE
        e2c = np.asarray(edge2cycle_list[mc])
        inc = jnp.asarray(
            (np.arange(e)[None, None, :] == e2c[:, :, None]).any(axis=1)
            .astype(np.float32))
        cols.append(inc @ edge)
    scores = jnp.stack(cols, axis=1)
    w = jax.nn.softmax(jnp.asarray(cpmlp, jnp.float32).reshape(-1) / temperature)
    return scores @ w


def _reference_forward_bf16(features_list, edge_index_list, edge2cycle_list,
                            gnn_weight, cpmlp, temperature=1.0):
    """Numerics-matched reference (same bf16 rounding points as the kernel)."""
    f32, bf16 = jnp.float32, jnp.bfloat16
    wb = jnp.asarray(gnn_weight, f32).astype(bf16)
    cols = []
    for mc in range(len(features_list)):
        x = jnp.asarray(features_list[mc], f32).astype(bf16)
        n = x.shape[0]
        ei = to_undirected(np.asarray(edge_index_list[mc]))
        e = ei.shape[1]
        a_hat = jnp.asarray(gcn_normalized_adjacency(ei, n)).astype(bf16)
        ht = jnp.dot(x.T, a_hat, preferred_element_type=f32).astype(bf16)
        zt = jnp.dot(wb.T, ht, preferred_element_type=f32)
        zt = jnp.where(zt > 0, zt, NEG_SLOPE * zt).astype(bf16)
        zs = zt[:, jnp.asarray(ei[0])].astype(f32)
        zd = zt[:, jnp.asarray(ei[1])].astype(f32)
        pe = (zs * zd).astype(bf16).astype(f32)                       # [F_out, E]
        edge = pe.sum(axis=0) * jnp.ones((e,), f32)
        e2c = np.asarray(edge2cycle_list[mc])
        inc = jnp.asarray(
            (np.arange(e)[None, None, :] == e2c[:, :, None]).any(axis=1)
            .astype(np.float32))
        cols.append(inc @ edge)
    scores = jnp.stack(cols, axis=1)
    w = jax.nn.softmax(jnp.asarray(cpmlp, jnp.float32).reshape(-1) / temperature)
    return scores @ w


# ----------------------------------- main ------------------------------------


if __name__ == "__main__":
    key = jax.random.PRNGKey(0)

    model_num = 2
    num_nodes = 16
    gnn_input = 16
    gnn_output = 32
    num_cycles = 8
    edges_per_cycle = 4

    k_w, k_f0, k_f1 = jax.random.split(key, 3)
    gnn_weight = (jax.random.normal(k_w, (gnn_input, gnn_output), jnp.float32)
                  * (1.0 / np.sqrt(gnn_input)))
    cpmlp = jnp.ones((model_num, 1), jnp.float32)        # self.CPMLP = ones(M, 1)

    features = [
        jax.random.normal(k_f0, (num_nodes, gnn_input), jnp.float32),
        jax.random.normal(k_f1, (num_nodes, gnn_input), jnp.float32),
    ]

    # per-model directed edge_index: a ring graph (16 directed edges each)
    ring_src = np.arange(num_nodes)
    ring_dst = (np.arange(num_nodes) + 1) % num_nodes
    edge_indices = [
        np.stack([ring_src, ring_dst], axis=0).astype(np.int64),
        np.stack([ring_dst, ring_src], axis=0).astype(np.int64),
    ]

    # per-model Edge2cycle: each cycle lists 4 edge ids in the undirected list
    e2c = np.arange(num_cycles * edges_per_cycle).reshape(
        num_cycles, edges_per_cycle).astype(np.int64)
    edge2cycles = [e2c, e2c]

    out = cbgnn_forward(features, edge_indices, edge2cycles,
                        gnn_weight, cpmlp, temperature=1.0)
    out = np.asarray(jax.block_until_ready(out))

    ref_bf16 = np.asarray(jax.block_until_ready(
        _reference_forward_bf16(features, edge_indices, edge2cycles,
                                gnn_weight, cpmlp, temperature=1.0)))
    ref_f32 = np.asarray(jax.block_until_ready(
        _reference_forward_f32(features, edge_indices, edge2cycles,
                               gnn_weight, cpmlp, temperature=1.0)))

    assert out.shape == (num_cycles,)
    assert np.all(np.isfinite(out))
    # Kernel correctness: match a reference with identical bf16 rounding points.
    np.testing.assert_allclose(out, ref_bf16, rtol=1e-2, atol=1e-2)
    # bf16 quantization drift vs the exact f32 torch-semantics reference.
    rel_l2 = np.linalg.norm(out - ref_f32) / max(np.linalg.norm(ref_f32), 1e-12)
    assert rel_l2 < 5e-2, f"bf16 drift too large: {rel_l2}"
    print("KERNEL_OK")
</pallas_src>

<mosaic_0001>
module attributes {stable_mosaic.version = 11 : i64} {
  func.func @_cbgnn_fused_kernel(%arg0: memref<16x32xbf16, #tpu.memory_space<vmem>>, %arg1: memref<32x32xbf16, #tpu.memory_space<vmem>>, %arg2: memref<32x16xbf16, #tpu.memory_space<vmem>>, %arg3: memref<32x64xbf16, #tpu.memory_space<vmem>>, %arg4: memref<32x64xbf16, #tpu.memory_space<vmem>>, %arg5: memref<64x128xbf16, #tpu.memory_space<vmem>>, %arg6: memref<1x128xf32, #tpu.memory_space<vmem>>) attributes {dimension_semantics = [], scalar_prefetch = 0 : i64, scratch_operands = 0 : i64, tpu.core_type = #tpu.core_type<tc>} {
    %c0 = arith.constant 0 : index
    %c0_0 = arith.constant 0 : index
    %0 = vector.load %arg0[%c0, %c0_0] : memref<16x32xbf16, #tpu.memory_space<vmem>>, vector<16x32xbf16>
    %c0_1 = arith.constant 0 : index
    %c0_2 = arith.constant 0 : index
    %1 = vector.load %arg1[%c0_1, %c0_2] : memref<32x32xbf16, #tpu.memory_space<vmem>>, vector<32x32xbf16>
    %cst = arith.constant dense<0.000000e+00> : vector<16x32xf32>
    %2 = tpu.matmul %0, %1, %cst {dimension_numbers = #tpu.dot_dimension_numbers<[1], [0], [0], [1], [0, 0, 1, 1], [], []>} : vector<16x32xbf16>, vector<32x32xbf16>, vector<16x32xf32> -> vector<16x32xf32>
    %c0_3 = arith.constant 0 : index
    %c0_4 = arith.constant 0 : index
    %3 = vector.load %arg2[%c0_3, %c0_4] : memref<32x16xbf16, #tpu.memory_space<vmem>>, vector<32x16xbf16>
    %4 = arith.truncf %2 : vector<16x32xf32> to vector<16x32xbf16>
    %cst_5 = arith.constant dense<0.000000e+00> : vector<32x32xf32>
    %5 = tpu.matmul %3, %4, %cst_5 {dimension_numbers = #tpu.dot_dimension_numbers<[1], [0], [0], [1], [0, 0, 1, 1], [], []>} : vector<32x16xbf16>, vector<16x32xbf16>, vector<32x32xf32> -> vector<32x32xf32>
    %cst_6 = arith.constant 0.000000e+00 : f32
    %6 = vector.broadcast %cst_6 : f32 to vector<32x32xf32>
    %7 = arith.cmpf ogt, %5, %6 : vector<32x32xf32>
    %cst_7 = arith.constant 0.00999999977 : f32
    %8 = vector.broadcast %cst_7 : f32 to vector<32x32xf32>
    %9 = arith.mulf %8, %5 : vector<32x32xf32>
    %10 = arith.select %7, %5, %9 : vector<32x32xi1>, vector<32x32xf32>
    %11 = arith.truncf %10 : vector<32x32xf32> to vector<32x32xbf16>
    %c0_8 = arith.constant 0 : index
    %c0_9 = arith.constant 0 : index
    %12 = vector.load %arg3[%c0_8, %c0_9] : memref<32x64xbf16, #tpu.memory_space<vmem>>, vector<32x64xbf16>
    %cst_10 = arith.constant dense<0.000000e+00> : vector<32x64xf32>
    %13 = tpu.matmul %11, %12, %cst_10 {dimension_numbers = #tpu.dot_dimension_numbers<[1], [0], [0], [1], [0, 0, 1, 1], [], []>} : vector<32x32xbf16>, vector<32x64xbf16>, vector<32x64xf32> -> vector<32x64xf32>
    %c0_11 = arith.constant 0 : index
    %c0_12 = arith.constant 0 : index
    %14 = vector.load %arg4[%c0_11, %c0_12] : memref<32x64xbf16, #tpu.memory_space<vmem>>, vector<32x64xbf16>
    %cst_13 = arith.constant dense<0.000000e+00> : vector<32x64xf32>
    %15 = tpu.matmul %11, %14, %cst_13 {dimension_numbers = #tpu.dot_dimension_numbers<[1], [0], [0], [1], [0, 0, 1, 1], [], []>} : vector<32x32xbf16>, vector<32x64xbf16>, vector<32x64xf32> -> vector<32x64xf32>
    %16 = arith.mulf %13, %15 : vector<32x64xf32>
    %17 = arith.truncf %16 : vector<32x64xf32> to vector<32x64xbf16>
    %c0_14 = arith.constant 0 : index
    %c0_15 = arith.constant 0 : index
    %18 = vector.load %arg5[%c0_14, %c0_15] : memref<64x128xbf16, #tpu.memory_space<vmem>>, vector<64x128xbf16>
    %cst_16 = arith.constant dense<0.000000e+00> : vector<32x128xf32>
    %19 = tpu.matmul %17, %18, %cst_16 {dimension_numbers = #tpu.dot_dimension_numbers<[1], [0], [0], [1], [0, 0, 1, 1], [], []>} : vector<32x64xbf16>, vector<64x128xbf16>, vector<32x128xf32> -> vector<32x128xf32>
    %cst_17 = arith.constant dense<0.000000e+00> : vector<128xf32>
    %20 = vector.multi_reduction <add>, %19, %cst_17 [0] : vector<32x128xf32> to vector<128xf32>
    %21 = vector.shape_cast %20 : vector<128xf32> to vector<1x128xf32>
    %c0_18 = arith.constant 0 : index
    %c0_19 = arith.constant 0 : index
    %22 = vector.load %arg6[%c0_18, %c0_19] : memref<1x128xf32, #tpu.memory_space<vmem>>, vector<1x128xf32>
    tpu.vector_store %arg6[%c0_18, %c0_19], %21 {strides = array<i32>} : memref<1x128xf32, #tpu.memory_space<vmem>>, vector<1x128xf32>,
    return
  }
}

</mosaic_0001>

<bundles_post_ra>
// kernel: tpu_custom_call.1
= control target key start
LH: loop header
LB: loop body
LE: loop exit
PB: predicated region body
PF: predicated region fallthrough
CT: control target
= control target key end

     0   :  { %11 = vsyncpa [#allocation3], 0  ;;  %s595_s0 = inlined_call_operand.vmem [shape: bf16[16,32], index: 0, kind: input, shape index: {}]   ;;  %s596_s1 = inlined_call_operand.vmem [shape: bf16[32,32], index: 1, kind: input, shape index: {}]   ;;  %s597_s2 = inlined_call_operand.vmem [shape: bf16[32,16], index: 2, kind: input, shape index: {}]   ;;  %s598_s3 = inlined_call_operand.hbm [shape: bf16[32,64], index: 3, kind: input, shape index: {}]   ;;  %s599_s4 = inlined_call_operand.hbm [shape: bf16[32,64], index: 4, kind: input, shape index: {}]   ;;  %s600_s5 = inlined_call_operand.hbm [shape: bf16[64,128], index: 5, kind: input, shape index: {}]   ;;  %s601_s6 = inlined_call_operand.hbm [shape: f32[1,128], index: 6, kind: output, shape index: {}]  }
   0x1   :  { %12 = vsyncpa [#allocation6], 0 }
   0x2   :  { %13 = vsyncpa [#allocation4], 0  ;;  %s37_s23 = sshll.u32 %s599_s4, 4  ;;  %s522_s24 = smov [#allocation5]   ;;  %s38_s23 = int_to_ptr.hbm [resolvable:$true] %s37_s23 }
   0x3   :  { %s39_s25 = sshll.u32 %s522_s24, 4  ;;  %s24_s28 = sshll.u32 %s598_s3, 4  ;;  %s40_s25 = int_to_ptr.vmem [resolvable:$true] %s39_s25  ;;  %s25_s28 = int_to_ptr.hbm [resolvable:$true] %s24_s28 }
   0x4   :  { %s523_s29 = smov 64   ;;  %s524_s30 = smov 4  }
   0x5   :  { %45 = dma.hbm_to_vmem [thread:$0]  %s38_s23, 256, %s40_s25, [#allocation6], %s523_s29, %s523_s29, %s524_s30  }
   0x6   :  { %s525_s7 = smov [#allocation2]   ;;  %s50_s11 = sshll.u32 %s600_s5, 4  ;;  %s51_s11 = int_to_ptr.hbm [resolvable:$true] %s50_s11 }
   0x7   :  { %s26_s8 = sshll.u32 %s525_s7, 4  ;;  %s526_s4 = smov [#allocation7]   ;;  %s27_s8 = int_to_ptr.vmem [resolvable:$true] %s26_s8 }
   0x8   :  { %32 = dma.hbm_to_vmem [thread:$0]  %s25_s28, 256, %s27_s8, [#allocation3], %s523_s29, %s523_s29, %s524_s30  }
   0x9   :  { %s52_s12 = sshll.u32 %s526_s4, 4  ;;  %s53_s12 = int_to_ptr.vmem [resolvable:$true] %s52_s12 }
   0xa   :  { %58 = dma.hbm_to_vmem [thread:$0]  %s51_s11, 512, %s53_s12, [#allocation6], %s523_s29, %s523_s29, %s524_s30  }
   0xb   :  { %516 = dma.done.wait [#allocation3], 256  }
   0xc   :  { %517 = vsyncadd [#allocation3], 4294967040 }
   0xd   :  { %518 = dma.done.wait [#allocation6], 768  }
   0xe   :  { %519 = vsyncadd [#allocation6], 4294966528  ;;  %v399_v0 = vld [vmem:[%s596_s1 + $0x8] sm:$0xff]  ;;  %v398_v1 = vld [vmem:[%s596_s1] sm:$0xff]  ;;  %vm95_vm0 = vcmask 261120   ;;  %vm128_vm1 = vcmask 130048  }
   0xf   :  { %105 = vmatpush.bf16.msra.mxu0 %v399_v0  ;;  %v397_v2 = vld [vmem:[%s595_s0] sm:$0xff]  ;;  %v401_v7 = vld [vmem:[%s597_s2 + $0x8] sm:$0xff]  ;;  %v405_v9 = vld [vmem:[#allocation5 + $0x8] sm:$0xff]  ;;  %vm282_vm6 = vcmask 523264   ;;  %s527_s0 = smov [#allocation8]   ;;  %s325_s22 = sshll.u32 %s601_s6, 4  ;;  %s326_s22 = int_to_ptr.hbm [resolvable:$true] %s325_s22 }
  0x10   :  { %v400_v6 = vld [vmem:[%s597_s2] sm:$0xff]  ;;  %v403_v8 = vld [vmem:[#allocation2 + $0x8] sm:$0xff]  ;;  %231 = vmatpush.bf16.msra.mxu3 %v405_v9  ;;  %v404_v11 = vld [vmem:[#allocation5] sm:$0xff]  ;;  %s323_s2 = sshll.u32 %s527_s0, 4  ;;  %s324_s2 = int_to_ptr.vmem [resolvable:$true] %s323_s2 }
  0x11   :  { %196 = vmatpush.bf16.msra.mxu2 %v403_v8  ;;  %v402_v10 = vld [vmem:[#allocation2] sm:$0xff]  ;;  %v409_v12 = vld [vmem:[#allocation7 + $0x18] sm:$0xff]  ;;  %v408_v27 = vld [vmem:[#allocation7 + $0x10] sm:$0xff] }
  0x12   :  { %v407_v28 = vld [vmem:[#allocation7 + $0x8] sm:$0xff]  ;;  %v406_v29 = vld [vmem:[#allocation7] sm:$0xff] }
  0x13   :  { %106 = vmatpush.bf16.msra.mxu0 %v398_v1 }
  0x14   :  { %232 = vmatpush.bf16.msra.mxu3 %v404_v11 }
  0x15   :  { %197 = vmatpush.bf16.msra.mxu2 %v402_v10 }
  0x16   :  { %348 = vmatmul.msk.bf16.vlgmr.msra.gmra.mxu0 %vm95_vm0, %v397_v2 }
  0x17   :  { %293 = vmatpush.bf16.msrb.mxu0 %v409_v12 }
  0x1b   :  { %294 = vmatpush.bf16.msrb.mxu0 %v408_v27 }
  0x1f   :  { %295 = vmatpush.bf16.msrb.mxu0 %v407_v28 }
  0x23   :  { %296 = vmatpush.bf16.msrb.mxu0 %v406_v29 }
  0x93   :  { %v108_v3 = vpop.f32.mrf.mxu0 }
  0x9b   :  { %v110_v4 = vpop.f32.mrf.mxu0 }
  0x9c   :  { %v117_v5 = vpack.c.bf16 %v110_v4, %v108_v3 }
  0x9e   :  { %142 = vmatpush.bf16.msra.mxu1 %v117_v5 }
  0xa1   :  { %357 = vmatmul.msk.bf16.vlgmr.msra.gmra.mxu1 %vm128_vm1, %v400_v6 }
  0xa2   :  { %410 = vmatpush.bf16.msrb.mxu1 %v409_v12 }
  0xa6   :  { %411 = vmatpush.bf16.msrb.mxu1 %v408_v27 }
  0xaa   :  { %412 = vmatpush.bf16.msrb.mxu1 %v407_v28 }
  0xae   :  { %413 = vmatpush.bf16.msrb.mxu1 %v406_v29 }
  0xb1   :  { %358 = vmatmul.msk.bf16.gmra.mxu1 %vm128_vm1, %v401_v7 }
 0x11e   :  { %v144_v13 = vpop.f32.mrf.mxu1 }
 0x11f   :  { %v158_v14 = vmul.f32 0.01, %v144_v13  ;;  %vm154_vm2 = vcmp.gt.f32.partialorder %v144_v13, 0.0 }
 0x121   :  { %v162_v17 = vsel %vm154_vm2, %v144_v13, %v158_v14 }
 0x126   :  { %v146_v15 = vpop.f32.mrf.mxu1 }
 0x127   :  { %vm155_vm3 = vcmp.gt.f32.partialorder %v146_v15, 0.0  ;;  %v159_v16 = vmul.f32 0.01, %v146_v15 }
 0x129   :  { %v163_v18 = vsel %vm155_vm3, %v146_v15, %v159_v16 }
 0x12a   :  { %v166_v19 = vpack.c.bf16 %v163_v18, %v162_v17 }
 0x12c   :  { %367 = vmatmul.msk.bf16.vlgmr.msra.gmra.mxu2 %vm95_vm0, %v166_v19  ;;  %377 = vmatmul.msk.bf16.vlgmr.msra.gmra.mxu3 %vm95_vm0, %v166_v19 }
 0x12e   :  { %v149_v20 = vpop.f32.mrf.mxu1 }
 0x12f   :  { %v160_v21 = vmul.f32 0.01, %v149_v20  ;;  %vm156_vm4 = vcmp.gt.f32.partialorder %v149_v20, 0.0 }
 0x131   :  { %v164_v24 = vsel %vm156_vm4, %v149_v20, %v160_v21 }
 0x136   :  { %v151_v22 = vpop.f32.mrf.mxu1 }
 0x137   :  { %vm157_vm5 = vcmp.gt.f32.partialorder %v151_v22, 0.0  ;;  %v161_v23 = vmul.f32 0.01, %v151_v22 }
 0x139   :  { %v165_v25 = vsel %vm157_vm5, %v151_v22, %v161_v23 }
 0x13a   :  { %v167_v26 = vpack.c.bf16 %v165_v25, %v164_v24 }
 0x13c   :  { %368 = vmatmul.msk.bf16.gmra.mxu2 %vm95_vm0, %v167_v26  ;;  %378 = vmatmul.msk.bf16.gmra.mxu3 %vm95_vm0, %v167_v26 }
 0x1af   :  { %v199_v30 = vpop.f32.mrf.mxu2  ;;  %v234_v31 = vpop.f32.mrf.mxu3 }
 0x1b0   :  { %v244_v34 = vmul.f32 %v234_v31, %v199_v30 }
 0x1b7   :  { %v201_v32 = vpop.f32.mrf.mxu2  ;;  %v236_v33 = vpop.f32.mrf.mxu3 }
 0x1b8   :  { %v245_v35 = vmul.f32 %v236_v33, %v201_v32 }
 0x1ba   :  { %v248_v36 = vpack.c.bf16 %v245_v35, %v244_v34 }
 0x1bc   :  { %395 = vmatmul.msk.bf16.vlgmr.msrb.gmra.mxu0 %vm282_vm6, %v248_v36 }
 0x1bf   :  { %v204_v37 = vpop.f32.mrf.mxu2  ;;  %v239_v38 = vpop.f32.mrf.mxu3 }
 0x1c0   :  { %v246_v41 = vmul.f32 %v239_v38, %v204_v37 }
 0x1c7   :  { %v206_v39 = vpop.f32.mrf.mxu2  ;;  %v241_v40 = vpop.f32.mrf.mxu3 }
 0x1c8   :  { %v247_v42 = vmul.f32 %v241_v40, %v206_v39 }
 0x1ca   :  { %v249_v43 = vpack.c.bf16 %v247_v42, %v246_v41 }
 0x1cc   :  { %396 = vmatmul.msk.bf16.vlgmr.msrb.gmra.mxu1 %vm282_vm6, %v249_v43 }
 0x239   :  { %v298_v44 = vpop.f32.mrf.mxu0 }
 0x241   :  { %v300_v46 = vpop.f32.mrf.mxu0 }
 0x242   :  { %v308_v47 = vadd.f32 %v300_v46, %v298_v44 }
 0x249   :  { %v303_v45 = vpop.f32.mrf.mxu1 }
 0x24a   :  { %v309_v48 = vadd.f32 %v308_v47, %v303_v45 }
 0x251   :  { %v305_v49 = vpop.f32.mrf.mxu1 }
 0x252   :  { %v310_v50 = vadd.f32 %v309_v48, %v305_v49 }
 0x254   :  { %v311_v51 = vrot.slane %v310_v50, 4 }
 0x256   :  { %v312_v52 = vadd.f32 %v311_v51, %v310_v50 }
 0x258   :  { %v313_v53 = vrot.slane %v312_v52, 2 }
 0x25a   :  { %v314_v54 = vadd.f32 %v313_v53, %v312_v52 }
 0x25c   :  { %v315_v55 = vrot.slane %v314_v54, 1 }
 0x25e   :  { %v316_v56 = vadd.f32 %v315_v55, %v314_v54 }
 0x260   :  { %317 = vst [vmem:[#allocation8] sm:$0x1] %v316_v56 }
 0x261   :  { %328 = dma.vmem_to_hbm [thread:$0]  %s324_s2, 16, %s326_s22, [#allocation4]  }
 0x262   :  { %520 = dma.done.wait [#allocation4], 16  }
 0x263   :  { %521 = vsyncadd [#allocation4], 4294967280 }
 0x264   :  { %333 = vsyncpa [#allocation3], 1 }
 0x265   :  { %334 = vsyncpa [#allocation6], 1 }
 0x266   :  { %335 = vsyncpa [#allocation4], 1 }

</bundles_post_ra>
